<compile_context>
chip_gen: v6e
topology: v6e:2x2x1
jax: 0.10.0
libtpu: 0.0.40
codegen_flags: <defaults>
</compile_context>

<pallas_src>
import functools

import jax
import jax.numpy as jnp
from jax.experimental import pallas as pl
from jax.experimental.pallas import tpu as pltpu


_LANES = 128            # full vreg lane width -> lane-dense blocks
_MAX_BLOCK_ROWS = 4096  # (4096, 128) f32 = 2 MiB per input tile; multiple of 32


def _cdiv(a, b):
    return -(-a // b)


def _wmse_kernel(t_ref, o_ref, w_ref, out_ref, acc_ref, *,
                 block_rows, total_rows, needs_mask):
    """Accumulate w * (t - o)^2 over the trailing (reduction) grid axis."""
    r = pl.program_id(1)

    @pl.when(r == 0)
    def _init():
        acc_ref[...] = jnp.zeros_like(acc_ref)

    # Inputs arrive in native dtype (halves DMA bytes for bf16); cast in-reg.
    t = t_ref[...].astype(jnp.float32)
    o = o_ref[...].astype(jnp.float32)
    w = w_ref[...].astype(jnp.float32)
    d = t - o
    contrib = w * d * d                      # pure VPU work, overlaps DMA

    if needs_mask:
        # Last row-tile is ragged: mask with a select so OOB garbage (even
        # NaN/inf) cannot reach the accumulator.
        rows = jax.lax.broadcasted_iota(jnp.int32, contrib.shape, 0)
        global_rows = r * block_rows + rows
        contrib = jnp.where(global_rows < total_rows, contrib, 0.0)

    acc_ref[...] += contrib

    @pl.when(r == pl.num_programs(1) - 1)
    def _finalize():
        # One cross-lane/sublane reduce per batch; splat into the lane-dense
        # (8, 128) per-batch partial slab (glue reads element [0, 0]).
        out_ref[...] = jnp.sum(acc_ref[...]) + jnp.zeros_like(out_ref)


def weighted_mse_loss(target, output, weights):
    """target, output: (B, C, H, W); weights broadcastable to (B, H, W)."""
    B, C, H, W = target.shape
    HW = H * W
    n = B * HW
    lanes = _LANES

    if HW % lanes == 0:
        # Zero-copy path: contiguous NCHW -> (B, C, HW//128, 128) is a free
        # reshape; the BlockSpec pins channel 0 so only channel-0 bytes move.
        rows = HW // lanes
        hw_pad = 0
        t4 = target.reshape(B, C, rows, lanes)
        o4 = output.reshape(B, C, rows, lanes)
    else:
        # TODO(synk): fold this channel-0 slice + lane pad into the BlockSpec
        # (in-kernel lane mask) so the ragged-HW case is also copy-free.
        rows = _cdiv(HW, lanes)
        hw_pad = rows * lanes - HW

        def _slice_pad(x):
            x0 = x[:, 0].reshape(B, HW)
            x0 = jnp.pad(x0, ((0, 0), (0, hw_pad)))
            return x0.reshape(B, 1, rows, lanes)

        t4 = _slice_pad(target)
        o4 = _slice_pad(output)

    # Weights: avoid materializing broadcasts -- pin the batch block index to
    # 0 in the index_map when weights has no (or a size-1) batch dim.
    wshape = tuple(weights.shape)
    if wshape == (B, H, W) or wshape == (1, H, W):
        wb = weights.reshape(wshape[0], HW)
    elif wshape == (H, W):
        wb = weights.reshape(1, HW)
    else:
        # TODO(synk): express other broadcast shapes via a dedicated BlockSpec
        # instead of materializing them.
        wb = jnp.broadcast_to(weights, (B, H, W)).reshape(B, HW)
    if hw_pad:
        wb = jnp.pad(wb, ((0, 0), (0, hw_pad)))   # zero weights -> sum exact
    bw = wb.shape[0]
    w3 = wb.reshape(bw, rows, lanes)

    # Row tiling along the (rows, 128) reduction plane.
    if rows <= _MAX_BLOCK_ROWS:
        block_rows = rows                     # full dim -> no (8,128) issue
    else:
        block_rows = _MAX_BLOCK_ROWS          # multiple of 32 -> any dtype
    r_tiles = _cdiv(rows, block_rows)
    needs_mask = (rows % block_rows) != 0

    grid = (B, r_tiles)                       # reduction axis last

    t_spec = pl.BlockSpec((None, None, block_rows, lanes),
                          lambda b, r: (b, 0, r, 0))      # channel pinned to 0
    if bw == B:
        w_spec = pl.BlockSpec((None, block_rows, lanes),
                              lambda b, r: (b, r, 0))
    else:
        w_spec = pl.BlockSpec((None, block_rows, lanes),
                              lambda b, r: (0, r, 0))     # broadcast, no copy

    itemsize = lambda x: jnp.dtype(x.dtype).itemsize
    bytes_accessed = (n * (itemsize(target) + itemsize(output))
                      + w3.size * itemsize(w3)
                      + B * 8 * 128 * 4)

    kernel = functools.partial(_wmse_kernel, block_rows=block_rows,
                               total_rows=rows, needs_mask=needs_mask)

    partials = pl.pallas_call(
        kernel,
        out_shape=jax.ShapeDtypeStruct((B, 8, 128), jnp.float32),
        grid_spec=pltpu.PrefetchScalarGridSpec(
            num_scalar_prefetch=0,
            grid=grid,
            in_specs=[t_spec, t_spec, w_spec],
            out_specs=pl.BlockSpec((None, 8, 128), lambda b, r: (b, 0, 0)),
            scratch_shapes=[pltpu.VMEM((block_rows, lanes), jnp.float32)],
        ),
        compiler_params=pltpu.CompilerParams(
            dimension_semantics=("parallel", "arbitrary"),
            vmem_limit_bytes=32 * 1024 * 1024,
        ),
        cost_estimate=pl.CostEstimate(
            flops=4 * n, transcendentals=0, bytes_accessed=bytes_accessed),
    )(t4, o4, w3)

    total = jnp.sum(partials[:, 0, 0])
    return total / jnp.float32(n)


if __name__ == "__main__":
    key = jax.random.PRNGKey(0)
    k1, k2, k3 = jax.random.split(key, 3)

    B, C, H, W = 2, 4, 16, 16
    target = jax.random.normal(k1, (B, C, H, W), dtype=jnp.float32)
    output = jax.random.normal(k2, (B, C, H, W), dtype=jnp.float32)
    weights = jax.random.uniform(k3, (B, H, W), dtype=jnp.float32)

    wmse = jax.jit(weighted_mse_loss)
    loss = jax.block_until_ready(wmse(target, output, weights))

    # Cross-check against plain-JAX reference of the PyTorch semantics.
    ref = jnp.mean(weights * (target[:, 0] - output[:, 0]) ** 2)
    assert jnp.allclose(loss, ref, rtol=1e-5, atol=1e-6), (loss, ref)

    print("KERNEL_OK")
</pallas_src>

<mosaic_0001>
module attributes {stable_mosaic.version = 11 : i64} {
  func.func @_wmse_kernel(%arg0: i32, %arg1: i32, %arg2: memref<1x1x2x128xf32, #tpu.memory_space<vmem>>, %arg3: memref<1x1x2x128xf32, #tpu.memory_space<vmem>>, %arg4: memref<1x2x128xf32, #tpu.memory_space<vmem>>, %arg5: memref<1x8x128xf32, #tpu.memory_space<vmem>>, %arg6: memref<2x128xf32, #tpu.memory_space<vmem>>) attributes {dimension_semantics = [#tpu.dimension_semantics<parallel>, #tpu.dimension_semantics<arbitrary>], iteration_bounds = array<i64: 2, 1>, scalar_prefetch = 0 : i64, scratch_operands = 1 : i64, tpu.core_type = #tpu.core_type<tc>, window_params = [{transform_indices = @transform_0, window_bounds = array<i64: 1, 1, 2, 128>}, {transform_indices = @transform_1, window_bounds = array<i64: 1, 1, 2, 128>}, {transform_indices = @transform_2, window_bounds = array<i64: 1, 2, 128>}, {transform_indices = @transform_3, window_bounds = array<i64: 1, 8, 128>}]} {
    %c0_i32 = arith.constant 0 : i32
    %0 = arith.cmpi eq, %arg1, %c0_i32 : i32
    %1 = arith.extui %0 : i1 to i32
    %c0_i32_0 = arith.constant 0 : i32
    %2 = arith.cmpi ne, %1, %c0_i32_0 : i32
    scf.if %2 {
      %cst = arith.constant 0.000000e+00 : f32
      %18 = vector.broadcast %cst : f32 to vector<2x128xf32>
      %c0_17 = arith.constant 0 : index
      %c0_18 = arith.constant 0 : index
      %19 = vector.load %arg6[%c0_17, %c0_18] : memref<2x128xf32, #tpu.memory_space<vmem>>, vector<2x128xf32>
      tpu.vector_store %arg6[%c0_17, %c0_18], %18 {strides = array<i32>} : memref<2x128xf32, #tpu.memory_space<vmem>>, vector<2x128xf32>,
    } else {
    }
    %c0 = arith.constant 0 : index
    %c0_1 = arith.constant 0 : index
    %c0_2 = arith.constant 0 : index
    %c0_3 = arith.constant 0 : index
    %3 = vector.load %arg2[%c0, %c0_1, %c0_2, %c0_3] : memref<1x1x2x128xf32, #tpu.memory_space<vmem>>, vector<1x1x2x128xf32>
    %4 = vector.shape_cast %3 : vector<1x1x2x128xf32> to vector<2x128xf32>
    %c0_4 = arith.constant 0 : index
    %c0_5 = arith.constant 0 : index
    %c0_6 = arith.constant 0 : index
    %c0_7 = arith.constant 0 : index
    %5 = vector.load %arg3[%c0_4, %c0_5, %c0_6, %c0_7] : memref<1x1x2x128xf32, #tpu.memory_space<vmem>>, vector<1x1x2x128xf32>
    %6 = vector.shape_cast %5 : vector<1x1x2x128xf32> to vector<2x128xf32>
    %c0_8 = arith.constant 0 : index
    %c0_9 = arith.constant 0 : index
    %c0_10 = arith.constant 0 : index
    %7 = vector.load %arg4[%c0_8, %c0_9, %c0_10] : memref<1x2x128xf32, #tpu.memory_space<vmem>>, vector<1x2x128xf32>
    %8 = vector.shape_cast %7 : vector<1x2x128xf32> to vector<2x128xf32>
    %9 = arith.subf %4, %6 : vector<2x128xf32>
    %10 = arith.mulf %8, %9 : vector<2x128xf32>
    %11 = arith.mulf %10, %9 : vector<2x128xf32>
    %c0_11 = arith.constant 0 : index
    %c0_12 = arith.constant 0 : index
    %12 = vector.load %arg6[%c0_11, %c0_12] : memref<2x128xf32, #tpu.memory_space<vmem>>, vector<2x128xf32>
    %13 = arith.addf %12, %11 : vector<2x128xf32>
    %c0_13 = arith.constant 0 : index
    %c0_14 = arith.constant 0 : index
    %14 = vector.load %arg6[%c0_13, %c0_14] : memref<2x128xf32, #tpu.memory_space<vmem>>, vector<2x128xf32>
    tpu.vector_store %arg6[%c0_13, %c0_14], %13 {strides = array<i32>} : memref<2x128xf32, #tpu.memory_space<vmem>>, vector<2x128xf32>,
    %c0_i32_15 = arith.constant 0 : i32
    %15 = arith.cmpi eq, %arg1, %c0_i32_15 : i32
    %16 = arith.extui %15 : i1 to i32
    %c0_i32_16 = arith.constant 0 : i32
    %17 = arith.cmpi ne, %16, %c0_i32_16 : i32
    scf.if %17 {
      %c0_17 = arith.constant 0 : index
      %c0_18 = arith.constant 0 : index
      %18 = vector.load %arg6[%c0_17, %c0_18] : memref<2x128xf32, #tpu.memory_space<vmem>>, vector<2x128xf32>
      %19 = vector.shape_cast %18 : vector<2x128xf32> to vector<1x2x128xf32>
      %cst = arith.constant dense<0.000000e+00> : vector<1xf32>
      %20 = vector.multi_reduction <add>, %19, %cst [1, 2] : vector<1x2x128xf32> to vector<1xf32>
      %21 = vector.shape_cast %20 : vector<1xf32> to vector<1x1x1xf32>
      %22 = vector.extract %21[0, 0, 0] : f32 from vector<1x1x1xf32>
      %cst_19 = arith.constant 0.000000e+00 : f32
      %23 = vector.broadcast %cst_19 : f32 to vector<8x128xf32>
      %24 = vector.broadcast %22 : f32 to vector<8x128xf32>
      %25 = arith.addf %24, %23 : vector<8x128xf32>
      %c0_20 = arith.constant 0 : index
      %c0_21 = arith.constant 0 : index
      %c0_22 = arith.constant 0 : index
      %26 = vector.load %arg5[%c0_20, %c0_21, %c0_22] : memref<1x8x128xf32, #tpu.memory_space<vmem>>, vector<1x8x128xf32>
      %27 = vector.shape_cast %26 : vector<1x8x128xf32> to vector<8x128xf32>
      %28 = vector.shape_cast %25 : vector<8x128xf32> to vector<1x8x128xf32>
      tpu.vector_store %arg5[%c0_20, %c0_21, %c0_22], %28 {strides = array<i32>} : memref<1x8x128xf32, #tpu.memory_space<vmem>>, vector<1x8x128xf32>,
    } else {
    }
    return
  }
  func.func @transform_0(%arg0: i32, %arg1: i32) -> (i32, i32, i32, i32) {
    %c0_i32 = arith.constant 0 : i32
    %c0_i32_0 = arith.constant 0 : i32
    %c0_i32_1 = arith.constant 0 : i32
    return %arg0, %c0_i32, %arg1, %c0_i32_0 : i32, i32, i32, i32
  }
  func.func @transform_1(%arg0: i32, %arg1: i32) -> (i32, i32, i32, i32) {
    %c0_i32 = arith.constant 0 : i32
    %c0_i32_0 = arith.constant 0 : i32
    %c0_i32_1 = arith.constant 0 : i32
    return %arg0, %c0_i32, %arg1, %c0_i32_0 : i32, i32, i32, i32
  }
  func.func @transform_2(%arg0: i32, %arg1: i32) -> (i32, i32, i32) {
    %c0_i32 = arith.constant 0 : i32
    %c0_i32_0 = arith.constant 0 : i32
    return %arg0, %arg1, %c0_i32 : i32, i32, i32
  }
  func.func @transform_3(%arg0: i32, %arg1: i32) -> (i32, i32, i32) {
    %c0_i32 = arith.constant 0 : i32
    %c0_i32_0 = arith.constant 0 : i32
    %c0_i32_1 = arith.constant 0 : i32
    return %arg0, %c0_i32, %c0_i32_0 : i32, i32, i32
  }
}

</mosaic_0001>

<bundles_post_ra>
// kernel: weighted_mse_loss.1
= control target key start
LH: loop header
LB: loop body
LE: loop exit
PB: predicated region body
PF: predicated region fallthrough
CT: control target
= control target key end

     0   :  { %s470_s12 = smov 0   ;;  %s472_s13 = smov 0   ;;  %s514_s0 = inlined_call_operand.vmem [shape: f32[2,4,2,128], index: 0, kind: input, shape index: {}]   ;;  %s515_s1 = inlined_call_operand.vmem [shape: f32[2,4,2,128], index: 1, kind: input, shape index: {}]   ;;  %s516_s2 = inlined_call_operand.vmem [shape: f32[2,2,128], index: 2, kind: input, shape index: {}]   ;;  %s517_s3 = inlined_call_operand.vmem [shape: f32[2,8,128], index: 3, kind: output, shape index: {}]  }
   0x1   :  { %s474_s14 = smov 0  }
   0x2 LB: > { %s25_s15 = sadd.s32 1, %s443_s13  ;;  %p387_p0 = scmp.ge.s32.totalorder %s447_s14, 1  ;;  %s447_s14 = sphi %s474_s14, %s13_s14   ;;  %s443_s13 = sphi %s472_s13, %s519_s13   ;;  %s439_s12 = sphi %s470_s12, %s518_s12  }
   0x3   : > { %p27_p1 = scmp.ge.s32.totalorder %s25_s15, 2  ;;  %p183_p2 = scmp.lt.s32.totalorder %s447_s14, 3 }
   0x5   : > { %s521_s15 = smov (%p27_p1, %s25_s15), 0  ;;  %p184_p3 = pnand %p387_p0, %p183_p2 }
   0x6   : > { %p224_p4 = scmp.lt.s32.totalorder (!%p184_p3), %s439_s12, 1 }
   0x7   : > { %187 = sbr.rel (%p184_p3) target bundleno = 236 (0xec), region = 32 }
   0xc   : > { %v449_v0 = vmov 0.0   ;;  %s523_s12 = smov (!%p224_p4, %s439_s12), 1  ;;  %vm269_vm0 = vcmask 1041408  }
   0xd   : > { %255 = vst [vmem:[#allocation2] sm:$0x3] %v449_v0  ;;  %s488_s16 = sshll.u32 %s523_s12, 3  ;;  %s392_s17 = sshll.u32 %s523_s12, 1 }
   0xe   : > { %s231_s20 = scalar_lea.vmem %s514_s0, %s488_s16  ;;  %s239_s23 = scalar_lea.vmem %s515_s1, %s488_s16 }
   0xf   : > { %s246_s26 = scalar_lea.vmem %s516_s2, %s392_s17  ;;  %v256_v1 = vld [vmem:[%s231_s20] sm:$0x3]  ;;  %s250_s29 = scalar_lea.vmem %s517_s3, %s488_s16 }
  0x10   : > { %v257_v2 = vld [vmem:[%s239_s23] sm:$0x3] }
  0x11   : > { %v258_v3 = vld [vmem:[%s246_s26] sm:$0x3]  ;;  %v259_v4 = vsub.f32 %v256_v1, %v257_v2 }
  0x13   : > { %v260_v5 = vmul.f32 %v259_v4, %v258_v3 }
  0x14   : > { %v262_v6 = vld [vmem:[#allocation2] sm:$0x3] }
  0x15   : > { %v261_v7 = vmul.f32 %v260_v5, %v259_v4 }
  0x17   : > { %v263_v8 = vadd.f32 %v262_v6, %v261_v7 }
  0x19   : > { %264 = vst [vmem:[#allocation2] sm:$0x3] %v263_v8 }
  0x20   : > { %v268_v9 = vld [vmem:[#allocation2] sm:$0x3] }
  0x21   : > { %v270_v10 = vsel %vm269_vm0, %v268_v9, 0.0 }
  0x22   : > { %271 = vadd.xlane.f32.xlu0 %v270_v10 }
  0xab   : > { %v272_v11 = vpop.xlane.xlu0 %271 }
  0xac   : > { %v273_v12 = vrot.slane %v272_v11, 4 }
  0xae   : > { %v274_v13 = vadd.f32 %v273_v12, %v272_v11 }
  0xb0   : > { %v275_v14 = vrot.slane %v274_v13, 2 }
  0xb2   : > { %v276_v15 = vadd.f32 %v275_v14, %v274_v13 }
  0xb4   : > { %v277_v16 = vrot.slane %v276_v15, 1 }
  0xb6   : > { %v278_v17 = vadd.f32 %v277_v16, %v276_v15 }
  0xb8   : > { %398 = vpush %v278_v17 }
  0xe9   : > { %s399_s30 = spop %398 }
  0xea   : > { %v280_v18 = vstv %s399_s30 }
  0xeb   : > { %282 = vst [vmem:[%s250_s29] sm:$0xff] %v280_v18 }
  0xec PF: > { %s13_s14 = sadd.s32 1, %s447_s14   ;;  %s518_s12 = smov %s443_s13 }
  0xed   : > { %p10_p5 = scmp.ge.s32.totalorder %s13_s14, 4   ;;  %s519_s13 = smov %s521_s15 }
  0xef   :  { %12 = sbr.rel (!%p10_p5) target bundleno = 2 (0x2), region = 76 }

</bundles_post_ra>
